<compile_context>
chip_gen: v7x
topology: tpu7x:2x2x1
jax: 0.10.0
libtpu: 0.0.40
codegen_flags: <defaults>
</compile_context>

<pallas_src>
import functools

import jax
import jax.numpy as jnp
import numpy as np
from jax import lax
from jax.experimental import pallas as pl
from jax.experimental.pallas import tpu as pltpu

_EPS = 1e-7
_INV_SQRT_2PI = float(1.0 / np.sqrt(2.0 * np.pi))
_LANES = 128
_STRIP = 32            # rows per in-kernel strip (4 vregs / operand, ~40 vregs live)
_MAX_BLOCK_ROWS = 2048  # 2x-buffered inputs ~10.5 MiB -> fits scoped VMEM everywhere


def _round_up(a, m):
    return -(-a // m) * m


def _shash_nll_kernel(params_ref, target_ref, out_ref, *, block_rows, strip):
    """One grid step: (4,R,128) params + (R,128) target -> (1,8,128) partial sum.

    The body iterates over `strip`-row slices so the working set stays in
    vregs; the only cross-strip state is a single (8,128) f32 accumulator
    carried through the fori_loop.
    """
    n_strips = block_rows // strip

    def strip_body(s, acc):
        r0 = pl.multiple_of(s * strip, strip)
        mu = params_ref[0, pl.ds(r0, strip), :]          # (strip, 128)
        sigma = params_ref[1, pl.ds(r0, strip), :]
        gamma = params_ref[2, pl.ds(r0, strip), :]
        tau = params_ref[3, pl.ds(r0, strip), :]
        x = target_ref[pl.ds(r0, strip), :]

        inv_sigma = pl.reciprocal(sigma)                 # shared by y and tau/sigma
        y = (x - mu) * inv_sigma
        y2p1 = 1.0 + y * y
        r = lax.rsqrt(y2p1)                              # reused: prob factor + asinh
        # asinh(y) = sign(y) * log(|y| + sqrt(1+y^2)); sqrt(1+y^2) = (1+y^2)*rsqrt(1+y^2)
        asinh_mag = jnp.log(jnp.abs(y) + y2p1 * r)
        asinh_y = jnp.where(y < 0.0, -asinh_mag, asinh_mag)

        w = tau * asinh_y - gamma
        e = jnp.exp(w)
        inv_e = jnp.exp(-w)                              # exact, independent of e
        z = 0.5 * (e - inv_e)                            # sinh(w)
        cosh_w = 0.5 * (e + inv_e)                       # == sqrt(1 + z^2)

        prob = (((tau * inv_sigma) * _INV_SQRT_2PI) * cosh_w * r
                * jnp.exp(-0.5 * (z * z)))
        nll = -jnp.log(prob + _EPS)

        # Fold (strip,128) -> (8,128) with 8-row aligned VPU adds.
        folded = nll[0:8]
        for rr in range(8, strip, 8):
            folded = folded + nll[rr:rr + 8]
        return acc + folded

    acc0 = jnp.zeros((8, _LANES), jnp.float32)
    unroll = 2 if n_strips > 1 else 1
    acc = lax.fori_loop(0, n_strips, strip_body, acc0, unroll=unroll)
    out_ref[0] = acc


def shash_nll(output, target, *, block_rows=_MAX_BLOCK_ROWS):
    """output: (N, 4) SHASH params [mu, sigma, gamma, tau]; target: (N,)."""
    n = output.shape[0]
    assert output.shape == (n, 4)
    assert target.shape == (n,)

    # ---- Tiling: rows of 128 lanes; block_rows rows per grid step. ----
    n_rows = _round_up(n, _LANES) // _LANES
    block_rows = max(_STRIP, (int(block_rows) // _STRIP) * _STRIP)
    block_rows = min(block_rows, _MAX_BLOCK_ROWS)
    # Prefer >= 2 grid blocks once blocks are large enough (v7x: 2 TCs share HBM).
    half_rows = _round_up(-(-n_rows // 2), _STRIP)
    if half_rows >= 256:
        block_rows = min(block_rows, half_rows)
    block_rows = max(_STRIP, min(block_rows, _round_up(n_rows, _STRIP)))

    n_rows_pad = _round_up(n_rows, block_rows)
    n_pad = n_rows_pad * _LANES
    num_blocks = n_rows_pad // block_rows

    # Single re-layout (N,4) -> (4, rows, 128) + benign padding (no in-kernel mask).
    params = jnp.transpose(output.astype(jnp.float32), (1, 0))          # (4, N)
    tgt = target.astype(jnp.float32)
    if n_pad != n:
        pad_vals = jnp.array([0.0, 1.0, 0.0, 1.0], jnp.float32)[:, None]
        params = jnp.concatenate(
            [params, jnp.broadcast_to(pad_vals, (4, n_pad - n))], axis=1)
        tgt = jnp.concatenate([tgt, jnp.zeros((n_pad - n,), jnp.float32)])
    params = params.reshape(4, n_rows_pad, _LANES)
    tgt = tgt.reshape(n_rows_pad, _LANES)

    kernel = functools.partial(_shash_nll_kernel,
                               block_rows=block_rows, strip=_STRIP)
    cost = pl.CostEstimate(
        flops=28 * n_pad,
        transcendentals=7 * n_pad,
        bytes_accessed=20 * n_pad + num_blocks * 8 * _LANES * 4,
    )

    partials = pl.pallas_call(
        kernel,
        out_shape=jax.ShapeDtypeStruct((num_blocks, 8, _LANES), jnp.float32),
        grid_spec=pltpu.PrefetchScalarGridSpec(
            num_scalar_prefetch=0,
            grid=(num_blocks,),
            in_specs=[
                pl.BlockSpec((4, block_rows, _LANES), lambda i: (0, i, 0)),
                pl.BlockSpec((block_rows, _LANES), lambda i: (i, 0)),
            ],
            out_specs=pl.BlockSpec((1, 8, _LANES), lambda i: (i, 0, 0)),
        ),
        compiler_params=pltpu.CompilerParams(
            dimension_semantics=("parallel",),
            vmem_limit_bytes=32 * 1024 * 1024,
        ),
        cost_estimate=cost,
    )(params, tgt)

    # Tiny epilogue: cross-lane reduce, remove the constant padded contribution,
    # divide by N.  Padded elements (mu=0, sigma=1, gamma=0, tau=1, x=0) each
    # contribute exactly nll = -log(1/sqrt(2*pi) + eps).
    total = jnp.sum(partials)
    if n_pad != n:
        pad_nll = -jnp.log(jnp.float32(_INV_SQRT_2PI) + jnp.float32(_EPS))
        total = total - jnp.float32(n_pad - n) * pad_nll
    return total / jnp.float32(n)


def shash_nll_ref(output, target):
    mu, sigma, gamma, tau = [output[:, i].astype(jnp.float32) for i in range(4)]
    x = target.astype(jnp.float32)
    y = (x - mu) / sigma
    z = jnp.sinh(tau * jnp.arcsinh(y) - gamma)
    prob = (
        tau / sigma / jnp.sqrt(2.0 * jnp.pi)
        * jnp.sqrt((1.0 + z * z) / (1.0 + y * y))
        * jnp.exp(-0.5 * z * z)
    )
    return jnp.mean(-jnp.log(prob + _EPS))


def _make_inputs(key, n):
    k_mu, k_sig, k_gam, k_tau, k_tgt = jax.random.split(key, 5)
    mu = jax.random.normal(k_mu, (n,), jnp.float32)
    sigma = jax.nn.softplus(jax.random.normal(k_sig, (n,), jnp.float32)) + 0.5
    gamma = 0.3 * jax.random.normal(k_gam, (n,), jnp.float32)
    tau = jax.nn.softplus(jax.random.normal(k_tau, (n,), jnp.float32)) + 0.5
    output = jnp.stack([mu, sigma, gamma, tau], axis=-1)     # (N, 4)
    target = jax.random.normal(k_tgt, (n,), jnp.float32)     # (N,)
    return output, target


if __name__ == "__main__":
    key = jax.random.PRNGKey(0)
    k1, k2 = jax.random.split(key, 2)

    # Small case: single block, exercises the padding-constant correction
    # (1000 elements -> one 32-row block of 4096 padded elements).
    out1, tgt1 = _make_inputs(k1, 1000)
    loss1 = jax.block_until_ready(shash_nll(out1, tgt1))
    ref1 = jax.block_until_ready(shash_nll_ref(out1, tgt1))
    np.testing.assert_allclose(np.asarray(loss1), np.asarray(ref1),
                               rtol=1e-5, atol=1e-5)

    # Multi-block case: block_rows=128 -> 3 blocks x 4 strips, parallel grid axis.
    out2, tgt2 = _make_inputs(k2, 33809)
    loss2 = jax.block_until_ready(shash_nll(out2, tgt2, block_rows=128))
    ref2 = jax.block_until_ready(shash_nll_ref(out2, tgt2))
    np.testing.assert_allclose(np.asarray(loss2), np.asarray(ref2),
                               rtol=1e-5, atol=1e-5)

    print("KERNEL_OK")
</pallas_src>

<mosaic_0001>
module attributes {stable_mosaic.version = 11 : i64} {
  func.func @_shash_nll_kernel(%arg0: i32, %arg1: memref<4x32x128xf32, #tpu.memory_space<vmem>>, %arg2: memref<32x128xf32, #tpu.memory_space<vmem>>, %arg3: memref<1x8x128xf32, #tpu.memory_space<vmem>>) attributes {dimension_semantics = [#tpu.dimension_semantics<parallel>], iteration_bounds = array<i64: 1>, scalar_prefetch = 0 : i64, scratch_operands = 0 : i64, tpu.core_type = #tpu.core_type<tc>, window_params = [{transform_indices = @transform_0, window_bounds = array<i64: 4, 32, 128>}, {transform_indices = @transform_1, window_bounds = array<i64: 32, 128>}, {transform_indices = @transform_2, window_bounds = array<i64: 1, 8, 128>}]} {
    %cst = arith.constant 0.000000e+00 : f32
    %0 = vector.broadcast %cst : f32 to vector<8x128xf32>
    %c0_i32 = arith.constant 0 : i32
    %c32_i32 = arith.constant 32 : i32
    %1 = arith.muli %c0_i32, %c32_i32 : i32
    %2 = tpu.assume_multiple %1, 32 : i32
    %c0 = arith.constant 0 : index
    %3 = arith.index_cast %2 : i32 to index
    %c0_0 = arith.constant 0 : index
    %4 = vector.load %arg1[%c0, %3, %c0_0] : memref<4x32x128xf32, #tpu.memory_space<vmem>>, vector<1x32x128xf32>
    %5 = vector.shape_cast %4 : vector<1x32x128xf32> to vector<32x128xf32>
    %c1 = arith.constant 1 : index
    %6 = arith.index_cast %2 : i32 to index
    %c0_1 = arith.constant 0 : index
    %7 = vector.load %arg1[%c1, %6, %c0_1] : memref<4x32x128xf32, #tpu.memory_space<vmem>>, vector<1x32x128xf32>
    %8 = vector.shape_cast %7 : vector<1x32x128xf32> to vector<32x128xf32>
    %c2 = arith.constant 2 : index
    %9 = arith.index_cast %2 : i32 to index
    %c0_2 = arith.constant 0 : index
    %10 = vector.load %arg1[%c2, %9, %c0_2] : memref<4x32x128xf32, #tpu.memory_space<vmem>>, vector<1x32x128xf32>
    %11 = vector.shape_cast %10 : vector<1x32x128xf32> to vector<32x128xf32>
    %c3 = arith.constant 3 : index
    %12 = arith.index_cast %2 : i32 to index
    %c0_3 = arith.constant 0 : index
    %13 = vector.load %arg1[%c3, %12, %c0_3] : memref<4x32x128xf32, #tpu.memory_space<vmem>>, vector<1x32x128xf32>
    %14 = vector.shape_cast %13 : vector<1x32x128xf32> to vector<32x128xf32>
    %15 = arith.index_cast %2 : i32 to index
    %c0_4 = arith.constant 0 : index
    %16 = vector.load %arg2[%15, %c0_4] : memref<32x128xf32, #tpu.memory_space<vmem>>, vector<32x128xf32>
    %17 = tpu.reciprocal %8 : vector<32x128xf32> -> vector<32x128xf32>
    %18 = arith.subf %16, %5 : vector<32x128xf32>
    %19 = arith.mulf %18, %17 : vector<32x128xf32>
    %20 = arith.mulf %19, %19 : vector<32x128xf32>
    %cst_5 = arith.constant 1.000000e+00 : f32
    %21 = vector.broadcast %cst_5 : f32 to vector<32x128xf32>
    %22 = arith.addf %21, %20 : vector<32x128xf32>
    %23 = math.rsqrt %22 : vector<32x128xf32>
    %24 = math.absf %19 : vector<32x128xf32>
    %25 = arith.mulf %22, %23 : vector<32x128xf32>
    %26 = arith.addf %24, %25 : vector<32x128xf32>
    %27 = math.log %26 : vector<32x128xf32>
    %cst_6 = arith.constant 0.000000e+00 : f32
    %28 = vector.broadcast %cst_6 : f32 to vector<32x128xf32>
    %29 = arith.cmpf olt, %19, %28 : vector<32x128xf32>
    %cst_7 = arith.constant 0.000000e+00 : f32
    %30 = vector.broadcast %cst_7 : f32 to vector<32x128xf32>
    %31 = arith.subf %30, %27 : vector<32x128xf32>
    %32 = arith.select %29, %31, %27 : vector<32x128xi1>, vector<32x128xf32>
    %33 = arith.mulf %14, %32 : vector<32x128xf32>
    %34 = arith.subf %33, %11 : vector<32x128xf32>
    %35 = math.exp %34 : vector<32x128xf32>
    %cst_8 = arith.constant 0.000000e+00 : f32
    %36 = vector.broadcast %cst_8 : f32 to vector<32x128xf32>
    %37 = arith.subf %36, %34 : vector<32x128xf32>
    %38 = math.exp %37 : vector<32x128xf32>
    %39 = arith.subf %35, %38 : vector<32x128xf32>
    %cst_9 = arith.constant 5.000000e-01 : f32
    %40 = vector.broadcast %cst_9 : f32 to vector<32x128xf32>
    %41 = arith.mulf %40, %39 : vector<32x128xf32>
    %42 = arith.addf %35, %38 : vector<32x128xf32>
    %cst_10 = arith.constant 5.000000e-01 : f32
    %43 = vector.broadcast %cst_10 : f32 to vector<32x128xf32>
    %44 = arith.mulf %43, %42 : vector<32x128xf32>
    %45 = arith.mulf %14, %17 : vector<32x128xf32>
    %cst_11 = arith.constant 0.398942292 : f32
    %46 = vector.broadcast %cst_11 : f32 to vector<32x128xf32>
    %47 = arith.mulf %45, %46 : vector<32x128xf32>
    %48 = arith.mulf %47, %44 : vector<32x128xf32>
    %49 = arith.mulf %48, %23 : vector<32x128xf32>
    %50 = arith.mulf %41, %41 : vector<32x128xf32>
    %cst_12 = arith.constant -5.000000e-01 : f32
    %51 = vector.broadcast %cst_12 : f32 to vector<32x128xf32>
    %52 = arith.mulf %51, %50 : vector<32x128xf32>
    %53 = math.exp %52 : vector<32x128xf32>
    %54 = arith.mulf %49, %53 : vector<32x128xf32>
    %cst_13 = arith.constant 1.000000e-07 : f32
    %55 = vector.broadcast %cst_13 : f32 to vector<32x128xf32>
    %56 = arith.addf %54, %55 : vector<32x128xf32>
    %57 = math.log %56 : vector<32x128xf32>
    %cst_14 = arith.constant 0.000000e+00 : f32
    %58 = vector.broadcast %cst_14 : f32 to vector<32x128xf32>
    %59 = arith.subf %58, %57 : vector<32x128xf32>
    %60 = vector.extract_strided_slice %59 {offsets = [0, 0], sizes = [8, 128], strides = [1, 1]} : vector<32x128xf32> to vector<8x128xf32>
    %61 = vector.extract_strided_slice %59 {offsets = [8, 0], sizes = [8, 128], strides = [1, 1]} : vector<32x128xf32> to vector<8x128xf32>
    %62 = arith.addf %60, %61 : vector<8x128xf32>
    %63 = vector.extract_strided_slice %59 {offsets = [16, 0], sizes = [8, 128], strides = [1, 1]} : vector<32x128xf32> to vector<8x128xf32>
    %64 = arith.addf %62, %63 : vector<8x128xf32>
    %65 = vector.extract_strided_slice %59 {offsets = [24, 0], sizes = [8, 128], strides = [1, 1]} : vector<32x128xf32> to vector<8x128xf32>
    %66 = arith.addf %64, %65 : vector<8x128xf32>
    %67 = arith.addf %0, %66 : vector<8x128xf32>
    %c1_i32 = arith.constant 1 : i32
    %c0_15 = arith.constant 0 : index
    %c0_16 = arith.constant 0 : index
    %c0_17 = arith.constant 0 : index
    %68 = vector.load %arg3[%c0_15, %c0_16, %c0_17] : memref<1x8x128xf32, #tpu.memory_space<vmem>>, vector<1x8x128xf32>
    %69 = vector.shape_cast %68 : vector<1x8x128xf32> to vector<8x128xf32>
    %70 = vector.shape_cast %67 : vector<8x128xf32> to vector<1x8x128xf32>
    tpu.vector_store %arg3[%c0_15, %c0_16, %c0_17], %70 {strides = array<i32>} : memref<1x8x128xf32, #tpu.memory_space<vmem>>, vector<1x8x128xf32>,
    return
  }
  func.func @transform_0(%arg0: i32) -> (i32, i32, i32) {
    %c0_i32 = arith.constant 0 : i32
    %c0_i32_0 = arith.constant 0 : i32
    %c0_i32_1 = arith.constant 0 : i32
    return %c0_i32, %arg0, %c0_i32_0 : i32, i32, i32
  }
  func.func @transform_1(%arg0: i32) -> (i32, i32) {
    %c0_i32 = arith.constant 0 : i32
    %c0_i32_0 = arith.constant 0 : i32
    return %arg0, %c0_i32 : i32, i32
  }
  func.func @transform_2(%arg0: i32) -> (i32, i32, i32) {
    %c0_i32 = arith.constant 0 : i32
    %c0_i32_0 = arith.constant 0 : i32
    %c0_i32_1 = arith.constant 0 : i32
    return %arg0, %c0_i32, %c0_i32_0 : i32, i32, i32
  }
}

</mosaic_0001>

<bundles_post_ra>
// kernel: tpu_custom_call.1
= control target key start
LH: loop header
LB: loop body
LE: loop exit
PB: predicated region body
PF: predicated region fallthrough
CT: control target
= control target key end

     0   :  { %7 = vsyncpa [#allocation3], 0  ;;  %s469_s0 = inlined_call_operand.hbm [shape: f32[4,32,128], index: 0, kind: input, shape index: {}]   ;;  %s470_s1 = inlined_call_operand.hbm [shape: f32[32,128], index: 1, kind: input, shape index: {}]   ;;  %s471_s2 = inlined_call_operand.hbm [shape: f32[1,8,128], index: 2, kind: output, shape index: {}]  }
   0x1   :  { %8 = vsyncpa [#allocation6], 0 }
   0x2   :  { %9 = vsyncpa [#allocation4], 0  ;;  %s375_s9 = smov [#allocation2]   ;;  %s303_s13 = scalar_lea.hbm %s469_s0, 2048 }
   0x3   :  { %s15_s10 = sshll.u32 %s375_s9, 4  ;;  %p304_p0 = scmp.ne.s32.totalorder %s469_s0, %s303_s13  ;;  %s16_s10 = int_to_ptr.vmem [resolvable:$true] %s15_s10 }
   0x4   :  { %p307_p1 = scmp.lt.u32.totalorder %s303_s13, %s469_s0 }
   0x6   :  { %p309_p2 = pnand %p307_p1, %p304_p0 }
   0x8   :  { %312 = shalt.err (!%p309_p2)
}
   0x9   :  { %s313_s18 = scalar_lea.vmem %s16_s10, 2048  ;;  %p318_p4 = scmp.lt.s32.totalorder %s16_s10, %s16_s10 }
   0xa   :  { %p314_p3 = scmp.ne.s32.totalorder %s16_s10, %s313_s18  ;;  %p319_p5 = scmp.lt.s32.totalorder %s313_s18, %s313_s18 }
   0xc   :  { %p320_p6 = por %p319_p5, %p318_p4 }
   0xe   :  { %p321_p7 = pnand %p320_p6, %p314_p3 }
  0x10   :  { %324 = shalt.err (!%p321_p7)
}
  0x11   :  { %s376_s19 = smov 128   ;;  %s377_s20 = smov 8  }
  0x12   :  { %21 = dma.hbm_to_vmem [thread:$0]  %s469_s0, 2048, %s16_s10, [#allocation3], %s376_s19, %s376_s19, %s377_s20  }
  0x13   :  { %s378_s23 = smov [#allocation5]   ;;  %s325_s27 = scalar_lea.hbm %s470_s1, 512 }
  0x14   :  { %s27_s24 = sshll.u32 %s378_s23, 4  ;;  %p326_p8 = scmp.ne.s32.totalorder %s470_s1, %s325_s27  ;;  %s28_s24 = int_to_ptr.vmem [resolvable:$true] %s27_s24 }
  0x15   :  { %p329_p9 = scmp.lt.u32.totalorder %s325_s27, %s470_s1 }
  0x17   :  { %p331_p10 = pnand %p329_p9, %p326_p8 }
  0x19   :  { %334 = shalt.err (!%p331_p10)
}
  0x1a   :  { %s335_s4 = scalar_lea.vmem %s28_s24, 512  ;;  %p340_p12 = scmp.lt.s32.totalorder %s28_s24, %s28_s24 }
  0x1b   :  { %p336_p11 = scmp.ne.s32.totalorder %s28_s24, %s335_s4  ;;  %p341_p13 = scmp.lt.s32.totalorder %s335_s4, %s335_s4 }
  0x1d   :  { %p342_p0 = por %p341_p13, %p340_p12 }
  0x1f   :  { %p343_p1 = pnand %p342_p0, %p336_p11 }
  0x21   :  { %346 = shalt.err (!%p343_p1)
}
  0x22   :  { %33 = dma.hbm_to_vmem [thread:$0]  %s470_s1, 512, %s28_s24, [#allocation6], %s376_s19, %s376_s19, %s377_s20  }
  0x23   :  { %369 = dma.done.wait [#allocation3], 2048  }
  0x24   :  { %370 = vsyncadd [#allocation3], 4294965248 }
  0x25   :  { %371 = dma.done.wait [#allocation6], 512  }
  0x26   :  { %372 = vsyncadd [#allocation6], 4294966784  ;;  %v46_v0 = vld [vmem:[#allocation2 + $0x20] sm:$0xff]  ;;  %v47_v1 = vld [vmem:[#allocation2 + $0x28] sm:$0xff]  ;;  %s379_s1 = smov [#allocation7]  }
  0x27   :  { %v48_v2 = vld [vmem:[#allocation2 + $0x30] sm:$0xff]  ;;  %v49_v3 = vld [vmem:[#allocation2 + $0x38] sm:$0xff]  ;;  %247 = vrcp.f32 %v46_v0  ;;  %v40_v4 = vld [vmem:[#allocation2] sm:$0xff]  ;;  %s229_s6 = sshll.u32 %s379_s1, 4  ;;  %s230_s6 = int_to_ptr.vmem [resolvable:$true] %s229_s6 }
  0x28   :  { %249 = vrcp.f32 %v47_v1  ;;  %v62_v5 = vld [vmem:[#allocation5] sm:$0xff]  ;;  %v41_v6 = vld [vmem:[#allocation2 + $0x8] sm:$0xff]  ;;  %v42_v8 = vld [vmem:[#allocation2 + $0x10] sm:$0xff]  ;;  %s347_s7 = scalar_lea.vmem %s230_s6, 128  ;;  %p352_p3 = scmp.lt.s32.totalorder %s230_s6, %s230_s6 }
  0x29   :  { %251 = vrcp.f32 %v48_v2  ;;  %v63_v7 = vld [vmem:[#allocation5 + $0x8] sm:$0xff]  ;;  %v64_v9 = vld [vmem:[#allocation5 + $0x10] sm:$0xff]  ;;  %v43_v10 = vld [vmem:[#allocation2 + $0x18] sm:$0xff]  ;;  %v70_v12 = vsub.f32 %v62_v5, %v40_v4  ;;  %p348_p2 = scmp.ne.s32.totalorder %s230_s6, %s347_s7  ;;  %p353_p4 = scmp.lt.s32.totalorder %s347_s7, %s347_s7 }
  0x2a   :  { %253 = vrcp.f32 %v49_v3  ;;  %v65_v11 = vld [vmem:[#allocation5 + $0x18] sm:$0xff]  ;;  %v71_v13 = vsub.f32 %v63_v7, %v41_v6  ;;  %v72_v14 = vsub.f32 %v64_v9, %v42_v8  ;;  %v58_v54 = vld [vmem:[#allocation2 + $0x60] sm:$0xff]  ;;  %v59_v57 = vld [vmem:[#allocation2 + $0x68] sm:$0xff] }
  0x2b   :  { %v73_v16 = vsub.f32 %v65_v11, %v43_v10  ;;  %v52_v60 = vld [vmem:[#allocation2 + $0x40] sm:$0xff]  ;;  %v60_v61 = vld [vmem:[#allocation2 + $0x70] sm:$0xff]  ;;  %v53_v0 = vld [vmem:[#allocation2 + $0x48] sm:$0xff]  ;;  %p354_p5 = por %p353_p4, %p352_p3 }
  0x2c   :  { %v61_v1 = vld [vmem:[#allocation2 + $0x78] sm:$0xff]  ;;  %v54_v5 = vld [vmem:[#allocation2 + $0x50] sm:$0xff] }
  0x2d   :  { %v55_v8 = vld [vmem:[#allocation2 + $0x58] sm:$0xff]  ;;  %p355_p6 = pnand %p354_p5, %p348_p2 }
  0x31   :  { %v419_v15 = vpop.eup %247 }
  0x32   :  { %v421_v17 = vpop.eup %249  ;;  %v74_v18 = vmul.f32 %v419_v15, %v70_v12 }
  0x33   :  { %v424_v19 = vpop.eup %251  ;;  %v75_v20 = vmul.f32 %v421_v17, %v71_v13 }
  0x34   :  { %v427_v21 = vpop.eup %253  ;;  %v76_v22 = vmul.f32 %v424_v19, %v72_v14  ;;  %v78_v23 = vmul.f32 %v74_v18, %v74_v18  ;;  %v90_v32 = vand.u32 2147483647, %v74_v18  ;;  %vm110_vm0 = vcmp.lt.f32.partialorder %v74_v18, 0.0 }
  0x35   :  { %v431_v24 = vmul.f32 %v427_v21, %v73_v16  ;;  %v79_v25 = vmul.f32 %v75_v20, %v75_v20  ;;  %v91_v34 = vand.u32 2147483647, %v75_v20  ;;  %vm111_vm1 = vcmp.lt.f32.partialorder %v75_v20, 0.0 }
  0x36   :  { %v80_v26 = vmul.f32 %v76_v22, %v76_v22  ;;  %v82_v27 = vadd.f32 1.0, %v78_v23  ;;  %v92_v36 = vand.u32 2147483647, %v76_v22  ;;  %vm112_vm2 = vcmp.lt.f32.partialorder %v76_v22, 0.0 }
  0x37   :  { %v81_v28 = vmul.f32 %v431_v24, %v431_v24  ;;  %v83_v29 = vadd.f32 1.0, %v79_v25  ;;  %v93_v39 = vand.u32 2147483647, %v431_v24  ;;  %vm113_vm3 = vcmp.lt.f32.partialorder %v431_v24, 0.0 }
  0x38   :  { %v84_v30 = vadd.f32 1.0, %v80_v26  ;;  %255 = vrsqrt.f32 %v82_v27 }
  0x39   :  { %v85_v31 = vadd.f32 1.0, %v81_v28  ;;  %257 = vrsqrt.f32 %v83_v29 }
  0x3a   :  { %259 = vrsqrt.f32 %v84_v30 }
  0x3b   :  { %261 = vrsqrt.f32 %v85_v31 }
  0x42   :  { %v435_v33 = vpop.eup %255 }
  0x43   :  { %v437_v35 = vpop.eup %257  ;;  %v94_v37 = vmul.f32 %v435_v33, %v82_v27 }
  0x44   :  { %v440_v38 = vpop.eup %259  ;;  %v95_v40 = vmul.f32 %v437_v35, %v83_v29 }
  0x45   :  { %v444_v41 = vpop.eup %261  ;;  %v96_v42 = vmul.f32 %v440_v38, %v84_v30  ;;  %v98_v43 = vadd.f32 %v94_v37, %v90_v32  ;;  %v167_v37 = vmul.f32 %v421_v17, %v59_v57 }
  0x46   :  { %v97_v44 = vmul.f32 %v444_v41, %v85_v31  ;;  %v99_v45 = vadd.f32 %v95_v40, %v91_v34  ;;  %v168_v40 = vmul.f32 %v424_v19, %v60_v61 }
  0x47   :  { %v100_v46 = vadd.f32 %v96_v42, %v92_v36  ;;  %263 = vlog2.f32 %v98_v43  ;;  %v166_v36 = vmul.f32 %v419_v15, %v58_v54  ;;  %v169_v42 = vmul.f32 %v427_v21, %v61_v1 }
  0x48   :  { %v101_v47 = vadd.f32 %v97_v44, %v93_v39  ;;  %265 = vlog2.f32 %v99_v45 }
  0x49   :  { %267 = vlog2.f32 %v100_v46 }
  0x4a   :  { %269 = vlog2.f32 %v101_v47 }
  0x51   :  { %v264_v48 = vpop.eup %263 }
  0x52   :  { %v266_v49 = vpop.eup %265  ;;  %v103_v50 = vmul.f32 0.6931472, %v264_v48  ;;  %v170_v48 = vmul.f32 0.3989423, %v166_v36 }
  0x53   :  { %v268_v51 = vpop.eup %267  ;;  %v105_v52 = vmul.f32 0.6931472, %v266_v49  ;;  %v171_v49 = vmul.f32 0.3989423, %v167_v37 }
  0x54   :  { %v270_v53 = vpop.eup %269  ;;  %v107_v55 = vmul.f32 0.6931472, %v268_v51  ;;  %v114_v56 = vsub.f32 0.0, %v103_v50 }
  0x55   :  { %v109_v58 = vmul.f32 0.6931472, %v270_v53  ;;  %v115_v59 = vsub.f32 0.0, %v105_v52  ;;  %v172_v53 = vmul.f32 0.3989423, %v168_v40 }
  0x56   :  { %v116_v62 = vsub.f32 0.0, %v107_v55  ;;  %v118_v63 = vsel %vm110_vm0, %v114_v56, %v103_v50 }
  0x57   :  { %v117_v2 = vsub.f32 0.0, %v109_v58  ;;  %v119_v3 = vsel %vm111_vm1, %v115_v59, %v105_v52  ;;  %v122_v4 = vmul.f32 %v118_v63, %v58_v54 }
  0x58   :  { %v120_v6 = vsel %vm112_vm2, %v116_v62, %v107_v55  ;;  %v123_v7 = vmul.f32 %v119_v3, %v59_v57  ;;  %v173_v55 = vmul.f32 0.3989423, %v169_v42 }
  0x59   :  { %v121_v9 = vsel %vm113_vm3, %v117_v2, %v109_v58  ;;  %v124_v10 = vmul.f32 %v120_v6, %v60_v61  ;;  %v126_v11 = vsub.f32 %v122_v4, %v52_v60 }
  0x5a   :  { %v125_v12 = vmul.f32 %v121_v9, %v61_v1  ;;  %v127_v13 = vsub.f32 %v123_v7, %v53_v0 }
  0x5b   :  { %v128_v14 = vsub.f32 %v124_v10, %v54_v5  ;;  %v130_v16 = vmul.f32 1.442695, %v126_v11  ;;  %v138_v18 = vsub.f32 0.0, %v126_v11 }
  0x5c   :  { %v129_v20 = vsub.f32 %v125_v12, %v55_v8  ;;  %v132_v22 = vmul.f32 1.442695, %v127_v13  ;;  %v139_v23 = vsub.f32 0.0, %v127_v13 }
  0x5d   :  { %271 = vpow2.f32 %v130_v16  ;;  %v134_v24 = vmul.f32 1.442695, %v128_v14  ;;  %v140_v25 = vsub.f32 0.0, %v128_v14  ;;  %v142_v26 = vmul.f32 1.442695, %v138_v18 }
  0x5e   :  { %273 = vpow2.f32 %v132_v22  ;;  %v136_v27 = vmul.f32 1.442695, %v129_v20  ;;  %v141_v28 = vsub.f32 0.0, %v129_v20  ;;  %v144_v29 = vmul.f32 1.442695, %v139_v23 }
  0x5f   :  { %275 = vpow2.f32 %v134_v24  ;;  %v146_v30 = vmul.f32 1.442695, %v140_v25 }
  0x60   :  { %277 = vpow2.f32 %v136_v27  ;;  %v148_v31 = vmul.f32 1.442695, %v141_v28 }
  0x61   :  { %279 = vpow2.f32 %v142_v26 }
  0x62   :  { %281 = vpow2.f32 %v144_v29 }
  0x63   :  { %283 = vpow2.f32 %v146_v30 }
  0x64   :  { %285 = vpow2.f32 %v148_v31 }
  0x67   :  { %v272_v32 = vpop.eup %271 }
  0x68   :  { %v274_v34 = vpop.eup %273 }
  0x69   :  { %v276_v39 = vpop.eup %275 }
  0x6a   :  { %v278_v43 = vpop.eup %277 }
  0x6b   :  { %v280_v44 = vpop.eup %279 }
  0x6c   :  { %v282_v45 = vpop.eup %281  ;;  %v150_v46 = vsub.f32 %v272_v32, %v280_v44  ;;  %v158_v47 = vadd.f32 %v280_v44, %v272_v32 }
  0x6d   :  { %v284_v50 = vpop.eup %283  ;;  %v151_v51 = vsub.f32 %v274_v34, %v282_v45  ;;  %v159_v52 = vadd.f32 %v282_v45, %v274_v34 }
  0x6e   :  { %v286_v15 = vpop.eup %285  ;;  %v152_v54 = vsub.f32 %v276_v39, %v284_v50  ;;  %v154_v17 = vmul.f32 0.5, %v150_v46  ;;  %v160_v56 = vadd.f32 %v284_v50, %v276_v39  ;;  %v162_v57 = vmul.f32 0.5, %v158_v47 }
  0x6f   :  { %v153_v19 = vsub.f32 %v278_v43, %v286_v15  ;;  %v155_v58 = vmul.f32 0.5, %v151_v51  ;;  %v161_v21 = vadd.f32 %v286_v15, %v278_v43  ;;  %v163_v59 = vmul.f32 0.5, %v159_v52 }
  0x70   :  { %v156_v60 = vmul.f32 0.5, %v152_v54  ;;  %v164_v61 = vmul.f32 0.5, %v160_v56  ;;  %v174_v62 = vmul.f32 %v170_v48, %v162_v57  ;;  %v182_v63 = vmul.f32 %v154_v17, %v154_v17 }
  0x71   :  { %v157_v0 = vmul.f32 0.5, %v153_v19  ;;  %v165_v1 = vmul.f32 0.5, %v161_v21  ;;  %v175_v2 = vmul.f32 %v171_v49, %v163_v59  ;;  %v183_v3 = vmul.f32 %v155_v58, %v155_v58 }
  0x72   :  { %v176_v4 = vmul.f32 %v172_v53, %v164_v61  ;;  %v178_v5 = vmul.f32 %v435_v33, %v174_v62  ;;  %v184_v6 = vmul.f32 %v156_v60, %v156_v60  ;;  %v186_v7 = vmul.f32 -0.5, %v182_v63 }
  0x73   :  { %v177_v8 = vmul.f32 %v173_v55, %v165_v1  ;;  %v179_v9 = vmul.f32 %v437_v35, %v175_v2  ;;  %v185_v10 = vmul.f32 %v157_v0, %v157_v0  ;;  %v187_v11 = vmul.f32 -0.5, %v183_v3 }
  0x74   :  { %v180_v12 = vmul.f32 %v440_v38, %v176_v4  ;;  %v188_v13 = vmul.f32 -0.5, %v184_v6  ;;  %v190_v14 = vmul.f32 1.442695, %v186_v7 }
  0x75   :  { %v181_v16 = vmul.f32 %v444_v41, %v177_v8  ;;  %v189_v18 = vmul.f32 -0.5, %v185_v10  ;;  %v192_v20 = vmul.f32 1.442695, %v187_v11 }
  0x76   :  { %287 = vpow2.f32 %v190_v14  ;;  %v194_v22 = vmul.f32 1.442695, %v188_v13 }
  0x77   :  { %289 = vpow2.f32 %v192_v20  ;;  %v196_v23 = vmul.f32 1.442695, %v189_v18 }
  0x78   :  { %291 = vpow2.f32 %v194_v22 }
  0x79   :  { %293 = vpow2.f32 %v196_v23 }
  0x80   :  { %v288_v33 = vpop.eup %287 }
  0x81   :  { %v290_v24 = vpop.eup %289  ;;  %v198_v25 = vmul.f32 %v288_v33, %v178_v5 }
  0x82   :  { %v292_v35 = vpop.eup %291  ;;  %v199_v26 = vmul.f32 %v290_v24, %v179_v9 }
  0x83   :  { %v294_v27 = vpop.eup %293  ;;  %v200_v28 = vmul.f32 %v292_v35, %v180_v12  ;;  %v202_v38 = vadd.f32 1e-07, %v198_v25 }
  0x84   :  { %v201_v29 = vmul.f32 %v294_v27, %v181_v16  ;;  %v203_v30 = vadd.f32 1e-07, %v199_v26 }
  0x85   :  { %v204_v31 = vadd.f32 1e-07, %v200_v28  ;;  %295 = vlog2.f32 %v202_v38 }
  0x86   :  { %v205_v41 = vadd.f32 1e-07, %v201_v29  ;;  %297 = vlog2.f32 %v203_v30 }
  0x87   :  { %299 = vlog2.f32 %v204_v31 }
  0x88   :  { %301 = vlog2.f32 %v205_v41 }
  0x8f   :  { %v296_v32 = vpop.eup %295 }
  0x90   :  { %v298_v34 = vpop.eup %297  ;;  %v207_v36 = vmul.f32 0.6931472, %v296_v32 }
  0x91   :  { %v300_v37 = vpop.eup %299  ;;  %v209_v39 = vmul.f32 0.6931472, %v298_v34 }
  0x92   :  { %v302_v40 = vpop.eup %301  ;;  %v211_v42 = vmul.f32 0.6931472, %v300_v37  ;;  %v214_v43 = vsub.f32 0.0, %v207_v36 }
  0x93   :  { %v213_v44 = vmul.f32 0.6931472, %v302_v40  ;;  %v215_v45 = vsub.f32 0.0, %v209_v39 }
  0x94   :  { %v216_v46 = vsub.f32 0.0, %v211_v42 }
  0x95   :  { %v217_v47 = vsub.f32 0.0, %v213_v44  ;;  %v218_v48 = vadd.f32 %v215_v45, %v214_v43 }
  0x97   :  { %v219_v49 = vadd.f32 %v218_v48, %v216_v46 }
  0x99   :  { %v220_v50 = vadd.f32 %v219_v49, %v217_v47 }
  0x9b   :  { %222 = vst [vmem:[#allocation7] sm:$0xff] %v220_v50 }
  0x9c   :  { %358 = shalt.err (!%p355_p6)
}
  0x9d   :  { %s359_s10 = scalar_lea.hbm %s471_s2, 128 }
  0x9e   :  { %p360_p7 = scmp.ne.s32.totalorder %s471_s2, %s359_s10  ;;  %p363_p8 = scmp.lt.u32.totalorder %s359_s10, %s471_s2 }
  0xa0   :  { %p365_p9 = pnand %p363_p8, %p360_p7 }
  0xa2   :  { %368 = shalt.err (!%p365_p9)
}
  0xa3   :  { %232 = dma.vmem_to_hbm [thread:$0]  %s230_s6, 128, %s471_s2, [#allocation4]  }
  0xa4   :  { %373 = dma.done.wait [#allocation4], 128  }
  0xa5   :  { %374 = vsyncadd [#allocation4], 4294967168 }
  0xa6   :  { %236 = vsyncpa [#allocation3], 1 }
  0xa7   :  { %237 = vsyncpa [#allocation6], 1 }
  0xa8   :  { %238 = vsyncpa [#allocation4], 1 }

</bundles_post_ra>
